<compile_context>
chip_gen: v7x
topology: tpu7x:2x2x1
jax: 0.10.0
libtpu: 0.0.40
codegen_flags: <defaults>
</compile_context>

<pallas_src>
import functools

import jax
import jax.numpy as jnp
from jax.experimental import pallas as pl
from jax.experimental.pallas import tpu as pltpu

NEG_SLOPE = 0.01  # nn.LeakyReLU default negative_slope


def _vmem_capacity_bytes():
    try:
        return int(pltpu.get_tpu_info().vmem_capacity_bytes)
    except Exception:
        return 64 << 20  # conservative fallback (v7x per-TensorCore VMEM)


def _choose_tiles(n, c, hw, itemsize, block_bytes_hint=None):
    """Pick (TB, THW) so one input block is ~0.5-8 MiB and the double-buffered
    pipeline (plus scratch) stays well inside per-core VMEM."""
    vmem_cap = _vmem_capacity_bytes()
    if block_bytes_hint is not None:
        per_buf = int(block_bytes_hint)
    else:
        # one input block; 2 pipeline buffers + scratch + headroom must fit
        per_buf = max(512 << 10, min(vmem_cap // 6, 8 << 20))

    batch_bytes = c * hw * itemsize
    if batch_bytes <= per_buf:
        # A whole (C, HW) slab is small: keep HW untiled, pack batches.
        thw = hw
        tb = max(1, min(n, per_buf // max(batch_bytes, 1)))
        # v7x has 2 TensorCores: keep >= 2 parallel batch steps when possible.
        if tb >= n and n >= 2:
            tb = (n + 1) // 2
    else:
        # Large per-batch slab: tile the flattened spatial (lane) axis.
        tb = 1
        row_bytes = c * itemsize
        max_lanes = max(128, (per_buf // row_bytes) // 128 * 128)
        thw = min(hw, max_lanes)

    nb = -(-n // tb)
    n_t = -(-hw // thw)
    return tb, nb, thw, n_t, vmem_cap


def _make_kernel(c, hw, tb, thw, n_t, kernel_size, needs_mask):
    pad = kernel_size // 2
    inv_hw = 1.0 / float(hw)
    rem = hw - (n_t - 1) * thw  # valid lanes in the last HW tile (static)

    def _accumulate(x, sum_acc, max_acc, masked):
        if masked:
            lane = jax.lax.broadcasted_iota(jnp.int32, x.shape, 2)
            valid = lane < rem
            x_sum = jnp.where(valid, x, jnp.zeros_like(x))
            x_max = jnp.where(valid, x, jnp.full_like(x, -jnp.inf))
        else:
            x_sum = x
            x_max = x
        # f32 accumulation; widen at the reduce/accumulate, not the whole tile.
        sum_acc[...] += jnp.sum(x_sum, axis=2, dtype=jnp.float32)
        max_acc[...] = jnp.maximum(
            max_acc[...], jnp.max(x_max, axis=2).astype(jnp.float32))

    def kernel(x_ref, w_ref, o_ref, sum_acc, max_acc):
        # x_ref: (TB, C, THW) input block (C on sublanes, THW on lanes)
        # w_ref: (k,) Conv1d taps in SMEM (== torch conv.weight[0, 0, :])
        # o_ref: (TB, 1, C) lane-dense per-channel attention for this batch tile
        t = pl.program_id(1)
        last = n_t - 1

        @pl.when(t == 0)
        def _init():
            sum_acc[...] = jnp.zeros_like(sum_acc)
            max_acc[...] = jnp.full_like(max_acc, -jnp.inf)

        x = x_ref[...]
        if needs_mask:
            @pl.when(t < last)
            def _full_tile():
                _accumulate(x, sum_acc, max_acc, masked=False)

            @pl.when(t == last)
            def _remainder_tile():
                _accumulate(x, sum_acc, max_acc, masked=True)
        else:
            _accumulate(x, sum_acc, max_acc, masked=False)

        @pl.when(t == last)
        def _finalize():
            avg = sum_acc[...] * jnp.float32(inv_hw)          # (TB, C)
            mx = max_acc[...]                                  # (TB, C)
            stacked = jnp.concatenate([avg, mx], axis=0)       # (2*TB, C)
            if pad > 0:
                z = jnp.zeros((2 * tb, pad), jnp.float32)
                padded = jnp.concatenate([z, stacked, z], axis=1)
            else:
                padded = stacked
            # Conv1d(1, 1, k, padding=k//2, bias=False) along the channel axis
            # as k shifted (lane-offset) multiply-adds on the [avg ; max] stack
            # (cross-correlation orientation, matching PyTorch Conv1d).
            y = jnp.zeros((2 * tb, c), jnp.float32)
            for j in range(kernel_size):
                y = y + w_ref[j] * jax.lax.slice_in_dim(padded, j, j + c, axis=1)
            # LeakyReLU per branch, then sigmoid(avg_branch + max_branch).
            y = jnp.where(y >= 0, y, NEG_SLOPE * y)
            att = jax.nn.sigmoid(y[:tb] + y[tb:])              # (TB, C)
            o_ref[:, 0, :] = att.astype(o_ref.dtype)

    return kernel


@functools.partial(jax.jit, static_argnames=("kernel_size", "block_bytes_hint"))
def channel_attention(x, conv_weight, *, kernel_size, block_bytes_hint=None):
    """ChannelAttention forward.

    x: (N, C, H, W); conv_weight: (kernel_size,) == torch conv.weight[0, 0, :].
    Returns the (N, C, 1, 1) attention map.  PyTorch's expand_as(x) is a
    zero-copy broadcast view, so broadcasting against x is left to the caller
    (e.g. fuse `x * att`) instead of materializing an (N, C, H, W) tensor.
    kernel_size must be odd (as in the module, padding=k//2 keeps length only
    for odd k).
    """
    n, c, h, w = x.shape
    hw = h * w
    x_flat = x.reshape(n, c, hw)
    itemsize = jnp.dtype(x.dtype).itemsize

    tb, nb, thw, n_t, vmem_cap = _choose_tiles(n, c, hw, itemsize, block_bytes_hint)
    needs_mask = (n_t * thw) != hw

    kernel = _make_kernel(c, hw, tb, thw, n_t, kernel_size, needs_mask)

    # Scoped-VMEM limit: double-buffered input block + small scratch + headroom,
    # clamped to 3/4 of this generation's physical per-core VMEM.
    block_bytes = tb * c * thw * itemsize
    vmem_limit = int(min(max(2 * block_bytes + (4 << 20), 16 << 20),
                         (vmem_cap * 3) // 4))

    att = pl.pallas_call(
        kernel,
        out_shape=jax.ShapeDtypeStruct((n, 1, c), x.dtype),
        grid_spec=pltpu.PrefetchScalarGridSpec(
            num_scalar_prefetch=0,
            grid=(nb, n_t),
            in_specs=[
                pl.BlockSpec((tb, c, thw), lambda b, t: (b, 0, t)),
                pl.BlockSpec(memory_space=pltpu.MemorySpace.SMEM),  # conv taps
            ],
            out_specs=pl.BlockSpec((tb, 1, c), lambda b, t: (b, 0, 0)),
            scratch_shapes=[
                pltpu.VMEM((tb, c), jnp.float32),  # running per-channel sum
                pltpu.VMEM((tb, c), jnp.float32),  # running per-channel max
            ],
        ),
        compiler_params=pltpu.CompilerParams(
            dimension_semantics=("parallel", "arbitrary"),
            vmem_limit_bytes=vmem_limit,
        ),
    )(x_flat, conv_weight.astype(jnp.float32))

    return att.reshape(n, c, 1, 1)


def _reference_attention(x, conv_weight, kernel_size):
    """Pure-JAX reference for the per-channel attention (pre-expand_as)."""
    n, c, h, w = x.shape
    pad = kernel_size // 2
    avg = jnp.mean(x, axis=(2, 3))  # (N, C)
    mx = jnp.max(x, axis=(2, 3))    # (N, C)

    def conv1d(v):  # v: (N, C)
        vp = jnp.pad(v, ((0, 0), (pad, pad)))
        out = jnp.zeros_like(v)
        for j in range(kernel_size):
            out = out + conv_weight[j] * vp[:, j:j + c]
        return out

    def leaky(v):
        return jnp.where(v >= 0, v, NEG_SLOPE * v)

    return jax.nn.sigmoid(leaky(conv1d(avg)) + leaky(conv1d(mx)))  # (N, C)


if __name__ == "__main__":
    key = jax.random.PRNGKey(0)
    kx1, kx2, kx3, kw = jax.random.split(key, 4)

    KERNEL_SIZE = 3  # must be odd
    conv_weight = jax.random.normal(kw, (KERNEL_SIZE,), dtype=jnp.float32) * 0.5

    def check(x, name, **kwargs):
        out = jax.block_until_ready(
            channel_attention(x, conv_weight, kernel_size=KERNEL_SIZE, **kwargs))
        ref = _reference_attention(x, conv_weight, KERNEL_SIZE)
        n, c = x.shape[0], x.shape[1]
        assert out.shape == (n, c, 1, 1), name
        assert jnp.allclose(out[:, :, 0, 0], ref, atol=1e-5, rtol=1e-5), name

    # Case 1: canonical small shape — single HW tile, batch axis split into 2
    # parallel grid steps (keeps both v7x TensorCores busy).
    x1 = jax.random.normal(kx1, (2, 4, 16, 16), dtype=jnp.float32)
    check(x1, "case 1")

    # Case 2: odd batch / channels / spatial — exercises a partial batch block
    # and a non-128 lane width (full-extent block).
    x2 = jax.random.normal(kx2, (3, 5, 7, 9), dtype=jnp.float32)
    check(x2, "case 2")

    # Case 3: force the spatial-tiling path (multi-tile accumulation plus the
    # masked remainder tile) with a small per-block byte budget.
    x3 = jax.random.normal(kx3, (2, 8, 48, 48), dtype=jnp.float32)
    check(x3, "case 3", block_bytes_hint=64 * 1024)

    print("KERNEL_OK")
</pallas_src>

<mosaic_0001>
module attributes {stable_mosaic.version = 11 : i64} {
  func.func @kernel(%arg0: i32, %arg1: i32, %arg2: memref<1x4x256xf32, #tpu.memory_space<vmem>>, %arg3: memref<3xf32, #tpu.memory_space<smem>>, %arg4: memref<1x1x4xf32, #tpu.memory_space<vmem>>, %arg5: memref<1x4xf32, #tpu.memory_space<vmem>>, %arg6: memref<1x4xf32, #tpu.memory_space<vmem>>) attributes {dimension_semantics = [#tpu.dimension_semantics<parallel>, #tpu.dimension_semantics<arbitrary>], iteration_bounds = array<i64: 2, 1>, scalar_prefetch = 0 : i64, scratch_operands = 2 : i64, tpu.core_type = #tpu.core_type<tc>, window_params = [{transform_indices = @transform_0, window_bounds = array<i64: 1, 4, 256>}, {transform_indices = @transform_1, window_bounds = array<i64: 3>}, {transform_indices = @transform_2, window_bounds = array<i64: 1, 1, 4>}]} {
    %c0_i32 = arith.constant 0 : i32
    %0 = arith.cmpi eq, %arg1, %c0_i32 : i32
    %1 = arith.extui %0 : i1 to i32
    %c0_i32_0 = arith.constant 0 : i32
    %2 = arith.cmpi ne, %1, %c0_i32_0 : i32
    scf.if %2 {
      %cst_14 = arith.constant 0.000000e+00 : f32
      %15 = vector.broadcast %cst_14 : f32 to vector<1x4xf32>
      %c0_15 = arith.constant 0 : index
      %c0_16 = arith.constant 0 : index
      %16 = vector.load %arg5[%c0_15, %c0_16] : memref<1x4xf32, #tpu.memory_space<vmem>>, vector<1x4xf32>
      tpu.vector_store %arg5[%c0_15, %c0_16], %15 {strides = array<i32>} : memref<1x4xf32, #tpu.memory_space<vmem>>, vector<1x4xf32>,
      %cst_17 = arith.constant 0xFF800000 : f32
      %17 = vector.broadcast %cst_17 : f32 to vector<1x4xf32>
      %c0_18 = arith.constant 0 : index
      %c0_19 = arith.constant 0 : index
      %18 = vector.load %arg6[%c0_18, %c0_19] : memref<1x4xf32, #tpu.memory_space<vmem>>, vector<1x4xf32>
      tpu.vector_store %arg6[%c0_18, %c0_19], %17 {strides = array<i32>} : memref<1x4xf32, #tpu.memory_space<vmem>>, vector<1x4xf32>,
    } else {
    }
    %c0 = arith.constant 0 : index
    %c0_1 = arith.constant 0 : index
    %c0_2 = arith.constant 0 : index
    %3 = vector.load %arg2[%c0, %c0_1, %c0_2] : memref<1x4x256xf32, #tpu.memory_space<vmem>>, vector<1x4x256xf32>
    %c0_3 = arith.constant 0 : index
    %c0_4 = arith.constant 0 : index
    %4 = vector.load %arg5[%c0_3, %c0_4] : memref<1x4xf32, #tpu.memory_space<vmem>>, vector<1x4xf32>
    %cst = arith.constant dense<0.000000e+00> : vector<1x4xf32>
    %5 = vector.multi_reduction <add>, %3, %cst [2] : vector<1x4x256xf32> to vector<1x4xf32>
    %6 = arith.addf %4, %5 : vector<1x4xf32>
    %c0_5 = arith.constant 0 : index
    %c0_6 = arith.constant 0 : index
    %7 = vector.load %arg5[%c0_5, %c0_6] : memref<1x4xf32, #tpu.memory_space<vmem>>, vector<1x4xf32>
    tpu.vector_store %arg5[%c0_5, %c0_6], %6 {strides = array<i32>} : memref<1x4xf32, #tpu.memory_space<vmem>>, vector<1x4xf32>,
    %c0_7 = arith.constant 0 : index
    %c0_8 = arith.constant 0 : index
    %8 = vector.load %arg6[%c0_7, %c0_8] : memref<1x4xf32, #tpu.memory_space<vmem>>, vector<1x4xf32>
    %cst_9 = arith.constant dense<0xFF800000> : vector<1x4xf32>
    %9 = vector.multi_reduction <maximumf>, %3, %cst_9 [2] : vector<1x4x256xf32> to vector<1x4xf32>
    %10 = arith.maximumf %8, %9 : vector<1x4xf32>
    %c0_10 = arith.constant 0 : index
    %c0_11 = arith.constant 0 : index
    %11 = vector.load %arg6[%c0_10, %c0_11] : memref<1x4xf32, #tpu.memory_space<vmem>>, vector<1x4xf32>
    tpu.vector_store %arg6[%c0_10, %c0_11], %10 {strides = array<i32>} : memref<1x4xf32, #tpu.memory_space<vmem>>, vector<1x4xf32>,
    %c0_i32_12 = arith.constant 0 : i32
    %12 = arith.cmpi eq, %arg1, %c0_i32_12 : i32
    %13 = arith.extui %12 : i1 to i32
    %c0_i32_13 = arith.constant 0 : i32
    %14 = arith.cmpi ne, %13, %c0_i32_13 : i32
    scf.if %14 {
      %c0_14 = arith.constant 0 : index
      %c0_15 = arith.constant 0 : index
      %15 = vector.load %arg5[%c0_14, %c0_15] : memref<1x4xf32, #tpu.memory_space<vmem>>, vector<1x4xf32>
      %cst_16 = arith.constant 3.906250e-03 : f32
      %16 = vector.broadcast %cst_16 : f32 to vector<1x4xf32>
      %17 = arith.mulf %15, %16 : vector<1x4xf32>
      %c0_17 = arith.constant 0 : index
      %c0_18 = arith.constant 0 : index
      %18 = vector.load %arg6[%c0_17, %c0_18] : memref<1x4xf32, #tpu.memory_space<vmem>>, vector<1x4xf32>
      %19 = tpu.concatenate %17, %18 in 0 : vector<1x4xf32>, vector<1x4xf32> -> vector<2x4xf32>
      %cst_19 = arith.constant 0.000000e+00 : f32
      %20 = vector.broadcast %cst_19 : f32 to vector<2x1xf32>
      %21 = tpu.concatenate %20, %19, %20 in 1 : vector<2x1xf32>, vector<2x4xf32>, vector<2x1xf32> -> vector<2x6xf32>
      %cst_20 = arith.constant 0.000000e+00 : f32
      %22 = vector.broadcast %cst_20 : f32 to vector<2x4xf32>
      %c0_21 = arith.constant 0 : index
      %23 = memref.load %arg3[%c0_21] : memref<3xf32, #tpu.memory_space<smem>>
      %24 = vector.extract_strided_slice %21 {offsets = [0, 0], sizes = [2, 4], strides = [1, 1]} : vector<2x6xf32> to vector<2x4xf32>
      %25 = vector.broadcast %23 : f32 to vector<2x4xf32>
      %26 = arith.mulf %25, %24 : vector<2x4xf32>
      %27 = arith.addf %22, %26 : vector<2x4xf32>
      %c1 = arith.constant 1 : index
      %28 = memref.load %arg3[%c1] : memref<3xf32, #tpu.memory_space<smem>>
      %29 = vector.extract_strided_slice %21 {offsets = [0, 1], sizes = [2, 4], strides = [1, 1]} : vector<2x6xf32> to vector<2x4xf32>
      %30 = vector.broadcast %28 : f32 to vector<2x4xf32>
      %31 = arith.mulf %30, %29 : vector<2x4xf32>
      %32 = arith.addf %27, %31 : vector<2x4xf32>
      %c2 = arith.constant 2 : index
      %33 = memref.load %arg3[%c2] : memref<3xf32, #tpu.memory_space<smem>>
      %34 = vector.extract_strided_slice %21 {offsets = [0, 2], sizes = [2, 4], strides = [1, 1]} : vector<2x6xf32> to vector<2x4xf32>
      %35 = vector.broadcast %33 : f32 to vector<2x4xf32>
      %36 = arith.mulf %35, %34 : vector<2x4xf32>
      %37 = arith.addf %32, %36 : vector<2x4xf32>
      %cst_22 = arith.constant 0.000000e+00 : f32
      %38 = vector.broadcast %cst_22 : f32 to vector<2x4xf32>
      %39 = arith.cmpf oge, %37, %38 : vector<2x4xf32>
      %cst_23 = arith.constant 0.00999999977 : f32
      %40 = vector.broadcast %cst_23 : f32 to vector<2x4xf32>
      %41 = arith.mulf %40, %37 : vector<2x4xf32>
      %42 = arith.select %39, %37, %41 : vector<2x4xi1>, vector<2x4xf32>
      %43 = vector.extract_strided_slice %42 {offsets = [0, 0], sizes = [1, 4], strides = [1, 1]} : vector<2x4xf32> to vector<1x4xf32>
      %44 = vector.extract_strided_slice %42 {offsets = [1, 0], sizes = [1, 4], strides = [1, 1]} : vector<2x4xf32> to vector<1x4xf32>
      %45 = arith.addf %43, %44 : vector<1x4xf32>
      %46 = arith.negf %45 : vector<1x4xf32>
      %47 = math.exp %46 : vector<1x4xf32>
      %cst_24 = arith.constant 1.000000e+00 : f32
      %48 = vector.broadcast %cst_24 : f32 to vector<1x4xf32>
      %49 = arith.addf %48, %47 : vector<1x4xf32>
      %50 = arith.divf %48, %49 : vector<1x4xf32>
      %c0_25 = arith.constant 0 : index
      %c0_26 = arith.constant 0 : index
      %c0_27 = arith.constant 0 : index
      %51 = vector.load %arg4[%c0_25, %c0_26, %c0_27] : memref<1x1x4xf32, #tpu.memory_space<vmem>>, vector<1x1x4xf32>
      %52 = vector.shape_cast %51 : vector<1x1x4xf32> to vector<1x4xf32>
      %53 = vector.shape_cast %50 : vector<1x4xf32> to vector<1x1x4xf32>
      tpu.vector_store %arg4[%c0_25, %c0_26, %c0_27], %53 {strides = array<i32>} : memref<1x1x4xf32, #tpu.memory_space<vmem>>, vector<1x1x4xf32>,
    } else {
    }
    return
  }
  func.func @transform_0(%arg0: i32, %arg1: i32) -> (i32, i32, i32) {
    %c0_i32 = arith.constant 0 : i32
    %c0_i32_0 = arith.constant 0 : i32
    return %arg0, %c0_i32, %arg1 : i32, i32, i32
  }
  func.func @transform_1(%arg0: i32, %arg1: i32) -> i32 {
    %c0_i32 = arith.constant 0 : i32
    %c0_i32_0 = arith.constant 0 : i32
    return %c0_i32 : i32
  }
  func.func @transform_2(%arg0: i32, %arg1: i32) -> (i32, i32, i32) {
    %c0_i32 = arith.constant 0 : i32
    %c0_i32_0 = arith.constant 0 : i32
    %c0_i32_1 = arith.constant 0 : i32
    return %arg0, %c0_i32, %c0_i32_0 : i32, i32, i32
  }
}

</mosaic_0001>

<bundles_post_ra>
// kernel: channel_attention.1
= control target key start
LH: loop header
LB: loop body
LE: loop exit
PB: predicated region body
PF: predicated region fallthrough
CT: control target
= control target key end

     0   :  { %7 = vsyncpa [#allocation6], 0  ;;  %s848_s0 = inlined_call_operand.vmem [shape: f32[2,4,256], index: 0, kind: input, shape index: {}]   ;;  %s849_s1 = inlined_call_operand.vmem [shape: f32[3], index: 1, kind: input, shape index: {}]   ;;  %s850_s2 = inlined_call_operand.hbm [shape: f32[2,1,4], index: 2, kind: output, shape index: {}]  }
   0x1   :  { %8 = vsyncpa [#allocation5], 0 }
   0x2   :  { %10 = vsyncpa [#allocation5 + $0x1], 0  ;;  %s710_s9 = smov 0   ;;  %s712_s10 = smov 0  }
   0x3   :  { %s714_s11 = smov 0   ;;  %s716_s12 = smov 0  }
   0x4   :  { %s718_s13 = smov 0   ;;  %s720_s14 = smov 0  }
   0x5 LB: > { %s490_s15 = sadd.s32 4294967295, %s684_s14   ;;  %s491_s16 = sadd.s32 4294967294, %s684_s14   ;;  %s684_s14 = sphi %s720_s14, %s16_s14   ;;  %s680_s13 = sphi %s718_s13, %s859_s13   ;;  %s676_s12 = sphi %s716_s12, %s858_s12   ;;  %s672_s11 = sphi %s714_s11, %s857_s11   ;;  %s668_s10 = sphi %s712_s10, %s856_s10   ;;  %s664_s9 = sphi %s710_s9, %s855_s9  }
   0x6   : > { %s28_s17 = sadd.s32 1, %s680_s13  ;;  %s84_s18 = sadd.s32 1, %s672_s11 }
   0x7   : > { %p30_p0 = scmp.ge.s32.totalorder %s28_s17, 2  ;;  %p94_p1 = scmp.ne.s32.totalorder %s672_s11, %s668_s10 }
   0x8   : > { %p95_p2 = scmp.eq.s32.totalorder %s490_s15, 1  ;;  %p100_p3 = scmp.ne.s32.totalorder %s668_s10, %s664_s9 }
   0x9   : > { %s861_s17 = smov (%p30_p0, %s28_s17), 0  ;;  %p101_p5 = scmp.eq.s32.totalorder %s491_s16, 1 }
   0xa   : > { %p750_p4 = por %p95_p2, %p94_p1  ;;  %s81_s20 = ssub.s32 %s680_s13, %s861_s17 }
   0xb   : > { %p492_p6 = scmp.ge.s32.totalorder %s684_s14, 1  ;;  %p82_p7 = scmp.eq.s32.totalorder %s81_s20, 0 }
   0xc   : > { %p757_p8 = por %p101_p5, %p100_p3  ;;  %p108_p9 = scmp.lt.s32.totalorder %s684_s14, 3 }
   0xd   : > { %s763_s22 = scalar_select %p82_p7, %s672_s11, %s84_s18  }
   0xe   : > { %p765_p10 = pnand %p492_p6, %p108_p9  ;;  %p769_p11 = scmp.eq.s32.totalorder %s490_s15, 0 }
   0xf   : > { %s121_s27 = sshll.u32 %s849_s1, 4  ;;  %s122_s27 = int_to_ptr.vmem [resolvable:$true] %s121_s27 }
  0x10   : > { %p513_p12 = pneg %p765_p10  ;;  %s587_s28 = scalar_lea.vmem %s122_s27, 16 }
  0x11   : > { %p588_p0 = scmp.ne.s32.totalorder %s122_s27, %s587_s28  ;;  %p595_p5 = scmp.lt.s32.totalorder %s122_s27, %s122_s27 }
  0x12   : > { %p514_p13 = pnand %p769_p11, %p513_p12  ;;  %p596_p6 = scmp.lt.s32.totalorder %s587_s28, %s587_s28 }
  0x14   : > { %p589_p1 = pneg %p514_p13  ;;  %p597_p7 = por %p596_p6, %p595_p5 }
  0x16   : > { %p590_p2 = pnand %p589_p1, %p588_p0 }
  0x18   : > { %p591_p3 = pneg %p590_p2 }
  0x1a   : > { %p598_p9 = pnand %p597_p7, %p591_p3 }
  0x1c   : > { %601 = shalt.err (!%p598_p9)
}
  0x1d   : > { %s686_s29 = smov [#allocation4]   ;;  %147 = sbr.rel (%p765_p10) target bundleno = 640 (0x280), region = 28 }
  0x1e   : > { %516 = dma.vmem_to_smem (!%p514_p13), %s122_s27, 16, %s686_s29, [#allocation6]  }
  0x24   : > { %655 = dma.done.wait (%p769_p11), [#allocation6], 16  }
  0x25   : > { %657 = vsyncadd (%p769_p11), [#allocation6], 4294967280 }
  0x26   : > { %153 = sfence }
  0x27   : > { %p174_p12 = scmp.lt.s32.totalorder %s676_s12, 1  ;;  %vm195_vm0 = vcmask 1043456   ;;  %v687_v8 = vmov 0   ;;  %v202_v9 = vlaneseq  ;;  %vm187_vm1 = vcmask 24576   ;;  %s691_s7 = smov 1  }
  0x28   : > { %580 = vset.pattern.permute.xlu1 %v687_v8  ;;  %581 = vset.pattern.permute.xlu0 %v687_v8  ;;  %v688_v12 = vmov 0.0   ;;  %v689_v14 = vmov 1966171168   ;;  %v690_v44 = vmov -inf   ;;  %vm352_vm2 = vcmask 1040384   ;;  %s500_s8 = sld [smem:[#allocation4 + $0x1]] }
  0x29   : > { %s175_s30 = scalar_select %p174_p12, %s676_s12, 1  ;;  %v203_v10 = vshrl.u32 %v202_v9, 7  ;;  %v246_v11 = vand.u32 127, %v202_v9  ;;  %188 = vst.msk [vmem:[#allocation2] sm:$0x1] %vm187_vm1, %v688_v12  ;;  %v221_v15 = vunpack.c.l.s4 %v689_v14  ;;  %vm358_vm3 = vcmask 7168  }
  0x2a   : > { %189 = vst.msk [vmem:[#allocation3] sm:$0x1] %vm187_vm1, %v690_v44  ;;  %s501_s15 = sld [smem:[#allocation4 + $0x2]]  ;;  %vm360_vm4 = vcmask 39936   ;;  %s692_s16 = smov 127  }
  0x2b   : > { %s506_s3 = sshll.u32 %s175_s30, 3  ;;  %v249_v13 = vsub.s32 %v246_v11, %v203_v10  ;;  %v204_v16 = vsub.s32 0, %v203_v10  ;;  %v208_v17 = vsub.s32 1, %v203_v10  ;;  %v212_v18 = vsub.s32 2, %v203_v10  ;;  %s693_s18 = smov 126  }
  0x2c   : > { %s181_s6 = scalar_lea.vmem %s848_s0, %s506_s3  ;;  %v216_v19 = vsub.s32 3, %v203_v10  ;;  %v222_v20 = vunpack.c.0.s8 %v221_v15  ;;  %s362_s20 = sld [smem:[#allocation4]] }
  0x2d   : > { %v190_v0 = vld [vmem:[%s181_s6] sm:$0xff]  ;;  %s171_s23 = sand.u32 1, %s668_s10   ;;  %s503_s24 = sshll.u32 %s676_s12, 4 }
  0x2e   : > { %v193_v1 = vcombine.high %v190_v0, %v190_v0  ;;  %v196_v2 = vsel %vm195_vm0, %v190_v0, 0.0  ;;  %v270_v4 = vsel %vm195_vm0, %v190_v0, -inf  ;;  %v225_v26 = vsub.s32 %v222_v20, %v203_v10  ;;  %s172_s25 = scalar_lea.vmem [#allocation7], %s171_s23  ;;  %s800_s29 = scalar_lea.hbm %s850_s2, %s503_s24 }
  0x2f   : > { %v367_v61 = vstv %s500_s8  ;;  %s409_s26 = sshll.u32 %s172_s25, 4  ;;  %s397_s30 = scalar_lea.sflag [#allocation5], %s171_s23  ;;  %s802_s26 = int_to_ptr.vmem [resolvable:$true] %s409_s26 }
  0x30   : > { %v197_v3 = vsel %vm195_vm0, %v193_v1, 0.0  ;;  %v271_v5 = vsel %vm195_vm0, %v193_v1, -inf  ;;  %v191_v48 = vld [vmem:[#allocation2] sm:$0x1]  ;;  %s602_s3 = scalar_lea.vmem %s802_s26, 16  ;;  %s694_s12 = smov [#allocation7]  }
  0x31   : > { %v198_v6 = vadd.f32 %v197_v3, %v196_v2  ;;  %v272_v7 = vmax.f32 %v270_v4, %v271_v5  ;;  %v269_v54 = vld [vmem:[#allocation3] sm:$0x1]  ;;  %v375_v2 = vstv %s501_s15  ;;  %p603_p10 = scmp.ne.s32.totalorder %s802_s26, %s602_s3  ;;  %s606_s4 = sshll.u32 %s694_s12, 4  ;;  %s607_s4 = int_to_ptr.vmem [resolvable:$false] %s606_s4 }
  0x32   : > { %v363_v4 = vstv %s362_s20  ;;  %s608_s5 = scalar_lea.vmem %s607_s4, 32  ;;  %p609_p0 = scmp.lt.s32.totalorder %s802_s26, %s607_s4 }
  0x33   : > { %199 = vadd.xlane.f32.xlu0 %v198_v6  ;;  %p604_p11 = pnand %p603_p10, %p750_p4  ;;  %p610_p1 = scmp.lt.s32.totalorder %s608_s5, %s602_s3 }
  0x35   : > { %p605_p13 = pneg %p604_p11  ;;  %p611_p2 = por %p610_p1, %p609_p0 }
  0x37   : > { %273 = vmax.xlane.f32.xlu0 %v272_v7  ;;  %p612_p3 = pnand %p611_p2, %p605_p13 }
  0xc0   : > { %v200_v21 = vpop.xlane.xlu0 %199 }
  0xc1   : > { %v205_v22 = vrot.slane %v200_v21, %v204_v16  ;;  %v209_v23 = vrot.slane %v200_v21, %v208_v17  ;;  %v213_v24 = vrot.slane %v200_v21, %v212_v18  ;;  %v217_v25 = vrot.slane %v200_v21, %v216_v19 }
  0xc3   : > { %v218_v27 = vcombine.low %v205_v22, %v209_v23  ;;  %v219_v28 = vcombine.low %v213_v24, %v217_v25 }
  0xc4   : > { %v274_v29 = vpop.xlane.xlu0 %273 }
  0xc5   : > { %v279_v30 = vrot.slane %v274_v29, %v204_v16  ;;  %v283_v31 = vrot.slane %v274_v29, %v208_v17  ;;  %v287_v32 = vrot.slane %v274_v29, %v212_v18  ;;  %v291_v33 = vrot.slane %v274_v29, %v216_v19 }
  0xc6   : > { %v226_v34 = vrot.slane %v218_v27, %v225_v26  ;;  %v233_v35 = vrot.slane %v219_v28, %v225_v26 }
  0xc7   : > { %v292_v36 = vcombine.low %v279_v30, %v283_v31  ;;  %v293_v37 = vcombine.low %v287_v32, %v291_v33 }
  0xc8   : > { %v234_v38 = vcombine.low %v226_v34, %v233_v35 }
  0xc9   : > { %v300_v39 = vrot.slane %v292_v36, %v225_v26  ;;  %v307_v40 = vrot.slane %v293_v37, %v225_v26 }
  0xca   : > { %v241_v41 = vrot.slane %v234_v38, %v225_v26 }
  0xcb   : > { %v308_v42 = vcombine.low %v300_v39, %v307_v40 }
  0xcc   : > { %243 = vperm.xlu1 %580, %v241_v41  }
  0xcd   : > { %v315_v43 = vrot.slane %v308_v42, %v225_v26 }
  0xd0   : > { %317 = vperm.xlu1 %580, %v315_v43  }
 0x14b   : > { %v244_v45 = vpop.permute.xlu1 %243 }
 0x14c   : > { %v250_v46 = vrot.slane %v244_v45, %v249_v13 }
 0x14e   : > { %v257_v47 = vrot.slane %v250_v46, %v225_v26 }
 0x14f   : > { %v318_v49 = vpop.permute.xlu1 %317 }
 0x150   : > { %v264_v50 = vrot.slane %v257_v47, %v225_v26  ;;  %v322_v51 = vrot.slane %v318_v49, %v249_v13 }
 0x152   : > { %v266_v52 = vadd.f32 %v264_v50, %v191_v48  ;;  %v329_v53 = vrot.slane %v322_v51, %v225_v26 }
 0x154   : > { %268 = vst.msk [vmem:[#allocation2] sm:$0x1] %vm187_vm1, %v266_v52  ;;  %v336_v55 = vrot.slane %v329_v53, %v225_v26 }
 0x156   : > { %v338_v56 = vmax.f32 %v269_v54, %v336_v55 }
 0x158   : > { %339 = vst.msk [vmem:[#allocation3] sm:$0x1] %vm187_vm1, %v338_v56 }
 0x15b   : > { %v343_v57 = vld [vmem:[#allocation2] sm:$0x1] }
 0x15c   : > { %v344_v58 = vmul.f32 0.00390625, %v343_v57 }
 0x15f   : > { %v499_v59 = vld [vmem:[#allocation3] ss:$0 sm:$0xff] }
 0x160   : > { %v353_v60 = vsel %vm352_vm2, %v344_v58, %v499_v59 }
 0x161   : > { %355 = vrot.lane.b32.xlu0 %v353_v60, %s691_s7 }
 0x1d3   : > { %v356_v62 = vpop.permute.xlu0 %355 }
 0x1d4   : > { %v359_v63 = vsel %vm358_vm3, 0.0, %v356_v62 }
 0x1d5   : > { %v361_v0 = vsel %vm360_vm4, %v359_v63, 0.0 }
 0x1d6   : > { %v368_v1 = vmul.f32 %v367_v61, %v361_v0  ;;  %v376_v3 = vmul.f32 %v375_v2, %v361_v0  ;;  %v364_v6 = vmul.f32 %v363_v4, %v361_v0 }
 0x1d8   : > { %370 = vrot.lane.b32.xlu1 %v368_v1, %s692_s16 }
 0x1dc   : > { %378 = vrot.lane.b32.xlu1 %v376_v3, %s693_s18 }
 0x24a   : > { %v371_v5 = vpop.permute.xlu1 %370 }
 0x24b   : > { %v373_v7 = vadd.f32 %v371_v5, %v364_v6 }
 0x24e   : > { %v379_v8 = vpop.permute.xlu1 %378 }
 0x24f   : > { %v381_v9 = vadd.f32 %v379_v8, %v373_v7 }
 0x251   : > { %vm382_vm5 = vcmp.ge.f32.partialorder %v381_v9, 0.0  ;;  %v383_v10 = vmul.f32 0.01, %v381_v9 }
 0x253   : > { %v384_v11 = vsel %vm382_vm5, %v381_v9, %v383_v10 }
 0x254   : > { %v386_v12 = vrot.slane %v384_v11, 1 }
 0x256   : > { %v388_v13 = vadd.f32 %v386_v12, %v384_v11 }
 0x258   : > { %v502_v14 = vmul.f32 -1.442695, %v388_v13 }
 0x25a   : > { %583 = vpow2.f32 %v502_v14 }
 0x264   : > { %v584_v15 = vpop.eup %583 }
 0x265   : > { %v392_v16 = vadd.f32 1.0, %v584_v15 }
 0x267   : > { %585 = vrcp.f32 %v392_v16 }
 0x271   : > { %v586_v17 = vpop.eup %585 }
 0x272   : > { %395 = vst.msk [vmem:[%s172_s25] sm:$0x1] %vm187_vm1, %v586_v17 }
 0x273   : > { %615 = shalt.err (!%p612_p3)
}
 0x274   : > { %s616_s6 = scalar_lea.hbm %s800_s29, 16  ;;  %s620_s15 = scalar_lea.hbm %s850_s2, 32 }
 0x275   : > { %p617_p5 = scmp.ne.s32.totalorder %s800_s29, %s616_s6  ;;  %p621_p9 = scmp.lt.u32.totalorder %s800_s29, %s850_s2 }
 0x276   : > { %p622_p12 = scmp.lt.u32.totalorder %s620_s15, %s616_s6  ;;  %p624_p11 = scmp.lt.u32.totalorder %s616_s6, %s800_s29 }
 0x277   : > { %p618_p6 = pnand %p617_p5, %p750_p4 }
 0x278   : > { %p623_p10 = por %p622_p12, %p621_p9 }
 0x279   : > { %p619_p7 = pneg %p618_p6 }
 0x27a   : > { %p625_p13 = por %p624_p11, %p623_p10 }
 0x27c   : > { %p626_p0 = pnand %p625_p13, %p619_p7 }
 0x27e   : > { %629 = shalt.err (!%p626_p0)
}
 0x27f   : > { %511 = dma.vmem_to_hbm [thread:$0]  (%p750_p4), %s802_s26, 16, %s800_s29, %s397_s30  }
 0x280 PF: > { %p523_p1 = scmp.ge.s32.totalorder %s684_s14, 2  ;;  %s421_s20 = sand.u32 1, %s664_s9  }
 0x281   : > { %s422_s23 = scalar_lea.sflag [#allocation5], %s421_s20 }
 0x282   : > { %p518_p2 = pnand %p523_p1, %p757_p8 }
 0x284   : > { %659 = dma.done.wait (!%p518_p2), %s422_s23, 16  }
 0x285   : > { %661 = vsyncadd (!%p518_p2), %s422_s23, 4294967280  ;;  %s16_s14 = sadd.s32 1, %s684_s14   ;;  %s855_s9 = smov %s668_s10 }
 0x286   : > { %p13_p3 = scmp.ge.s32.totalorder %s16_s14, 4   ;;  %s856_s10 = smov %s672_s11 }
 0x287   : > { %s857_s11 = smov %s763_s22  ;;  %s858_s12 = smov %s680_s13 }
 0x288   : > { %s859_s13 = smov %s861_s17  ;;  %15 = sbr.rel (!%p13_p3) target bundleno = 5 (0x5), region = 76 }
 0x28f   :  { %426 = vsyncpa [#allocation5], 1 }
 0x290   :  { %428 = vsyncpa [#allocation5 + $0x1], 1 }
 0x291   :  { %429 = vsyncpa [#allocation6], 1 }
 0x292   :  { %431 = vsyncpa [#allocation6 + $0x1], 1 }

</bundles_post_ra>
